<compile_context>
chip_gen: v5e
topology: v5e:2x2
jax: 0.10.0
libtpu: 0.0.40
codegen_flags: <defaults>
</compile_context>

<pallas_src>
import jax
import jax.numpy as jnp
from jax.experimental import pallas as pl
from jax.experimental.pallas import tpu as pltpu


# ----------------------------------------------------------------------------
# True production floor for an identity forward(): emit no kernel at all.
# ----------------------------------------------------------------------------
@jax.jit
def final_classifier_forward(x):
    """FinalClassifier.forward is identity; zero kernels is the real optimum."""
    return x


# ----------------------------------------------------------------------------
# Pallas scaffold, variant A: zero data movement.
#   - input and output are the SAME HBM buffer (alias + donation),
#   - body is a dependency-only touch, so no DMA is generated.
# ----------------------------------------------------------------------------
def _noop_touch_kernel(x_ref, o_ref):
    # Output aliases the input buffer; the bytes are already correct.
    # touch() pins a read/write dependency so the aliased output counts as produced.
    pltpu.touch(o_ref)


def _zero_copy_call(x):
    return pl.pallas_call(
        _noop_touch_kernel,
        out_shape=jax.ShapeDtypeStruct(x.shape, x.dtype),
        in_specs=[pl.BlockSpec(memory_space=pl.ANY)],   # stay in HBM, no auto-DMA
        out_specs=pl.BlockSpec(memory_space=pl.ANY),    # stay in HBM, no auto-DMA
        input_output_aliases={0: 0},                    # output == input buffer
        compiler_params=pltpu.CompilerParams(has_side_effects=True),
    )(x)


_zero_copy_forward = jax.jit(_zero_copy_call, donate_argnums=(0,))


# ----------------------------------------------------------------------------
# Pallas scaffold, variant B (fallback): single-step VMEM pass-through.
# Known-good on TPU; costs one tiny load + one tiny (aliased) store.
# ----------------------------------------------------------------------------
def _identity_kernel(x_ref, o_ref):
    o_ref[...] = x_ref[...]


def _vmem_identity_call(x):
    return pl.pallas_call(
        _identity_kernel,
        out_shape=jax.ShapeDtypeStruct(x.shape, x.dtype),
        # Full-array block; (2, 306) is legal because block == full array dims.
        in_specs=[pl.BlockSpec(x.shape, lambda: (0,) * x.ndim,
                               memory_space=pltpu.MemorySpace.VMEM)],
        out_specs=pl.BlockSpec(x.shape, lambda: (0,) * x.ndim,
                               memory_space=pltpu.MemorySpace.VMEM),
        input_output_aliases={0: 0},
    )(x)


_vmem_identity_forward = jax.jit(_vmem_identity_call, donate_argnums=(0,))


# ----------------------------------------------------------------------------
# Parameters matching the PyTorch __init__ (Linear 306->153, Linear 153->1).
# They exist for fidelity only; forward() never touches them.
# ----------------------------------------------------------------------------
def init_params(key):
    k1, k2, k3, k4 = jax.random.split(key, 4)
    return {
        "FinalClassify1": {
            "weight": jax.random.normal(k1, (153, 306), jnp.float32) * 0.02,
            "bias": jax.random.normal(k2, (153,), jnp.float32) * 0.02,
        },
        "FinalClassify2": {
            "weight": jax.random.normal(k3, (1, 153), jnp.float32) * 0.02,
            "bias": jax.random.normal(k4, (1,), jnp.float32) * 0.02,
        },
        # self.sigmoid / self.relu / self.normalisation are stored as classes
        # (never instantiated) -> no parameters.
    }
    # TODO(synk): if forward() is ever rewired to use the classifier math,
    # do it in plain XLA (batch=2, K=306 is far too small for a custom kernel).


if __name__ == "__main__":
    key = jax.random.PRNGKey(0)
    _params = init_params(key)  # defined-but-unused, mirroring the PyTorch module

    x = jax.random.normal(jax.random.PRNGKey(0), (2, 306), jnp.float32)
    # Host-side reference for verification: no defensive *device* copy on the
    # call path; the real device buffer is donated to the kernel.
    x_host = jax.device_get(x)

    try:
        y = _zero_copy_forward(x)          # zero-byte-movement Pallas kernel
        y = jax.block_until_ready(y)
    except Exception:
        # Fallback: re-materialize the input and use the VMEM pass-through kernel.
        x = jnp.asarray(x_host)
        y = _vmem_identity_forward(x)
        y = jax.block_until_ready(y)

    y_host = jax.device_get(y)
    assert y_host.shape == x_host.shape and y_host.dtype == x_host.dtype
    assert (y_host == x_host).all()
    print("KERNEL_OK")
</pallas_src>

<mosaic_0001>
module attributes {stable_mosaic.version = 11 : i64} {
  func.func @_noop_touch_kernel(%arg0: memref<2x306xf32, #tpu.memory_space<any>>, %arg1: memref<2x306xf32, #tpu.memory_space<any>>) attributes {dimension_semantics = [], scalar_prefetch = 0 : i64, scratch_operands = 0 : i64, tpu.core_type = #tpu.core_type<tc>} {
    return
  }
}

module attributes {stable_mosaic.version = 11 : i64} {
  func.func @_identity_kernel(%arg0: memref<2x306xf32, #tpu.memory_space<vmem>>, %arg1: memref<2x306xf32, #tpu.memory_space<vmem>>) attributes {dimension_semantics = [], scalar_prefetch = 0 : i64, scratch_operands = 0 : i64, tpu.core_type = #tpu.core_type<tc>} {
    %c0 = arith.constant 0 : index
    %c0_0 = arith.constant 0 : index
    %0 = vector.load %arg0[%c0, %c0_0] : memref<2x306xf32, #tpu.memory_space<vmem>>, vector<2x306xf32>
    %c0_1 = arith.constant 0 : index
    %c0_2 = arith.constant 0 : index
    %1 = vector.load %arg1[%c0_1, %c0_2] : memref<2x306xf32, #tpu.memory_space<vmem>>, vector<2x306xf32>
    tpu.vector_store %arg1[%c0_1, %c0_2], %0 {strides = array<i32>} : memref<2x306xf32, #tpu.memory_space<vmem>>, vector<2x306xf32>,
    return
  }
}

</mosaic_0001>

<bundles_post_ra>
// kernel: _zero_copy_call.1
= control target key start
LH: loop header
LB: loop body
LE: loop exit
PB: predicated region body
PF: predicated region fallthrough
CT: control target
= control target key end

     0   :  { %s16_s0 = inlined_call_operand.hbm [shape: f32[2,306], index: 0, kind: input, shape index: {}, may-alias: {0,1}]   ;;  %s17_s1 = inlined_call_operand.hbm [shape: f32[2,306], index: 1, kind: output, shape index: {}, may-alias: {0,1}]  }

// kernel: _vmem_identity_call.1
= control target key start
LH: loop header
LB: loop body
LE: loop exit
PB: predicated region body
PF: predicated region fallthrough
CT: control target
= control target key end

     0   :  { %6 = vsyncpa [#allocation3], 0  ;;  %s119_s0 = inlined_call_operand.hbm [shape: f32[2,306], index: 0, kind: input, shape index: {}, may-alias: {0,1}]   ;;  %s120_s1 = inlined_call_operand.hbm [shape: f32[2,306], index: 1, kind: output, shape index: {}, may-alias: {0,1}]  }
   0x1   :  { %7 = vsyncpa [#allocation4], 0  ;;  %s13_s8 = sshll.u32 %s119_s0, 4  ;;  %s101_s9 = smov [#allocation2]   ;;  %s14_s8 = int_to_ptr.hbm [resolvable:$true] %s13_s8 }
   0x2   :  { %s15_s10 = sshll.u32 %s101_s9, 4  ;;  %s16_s10 = int_to_ptr.vmem [resolvable:$true] %s15_s10 }
   0x3   :  { %18 = dma.hbm_to_vmem [thread:$0]  %s14_s8, 96, %s16_s10, [#allocation3]  }
   0x4   :  { %97 = dma.done.wait [#allocation3], 96  }
   0x5   :  { %98 = vsyncadd [#allocation3], 4294967200  ;;  %vm24_vm0 = vcmask 1041408   ;;  %vm25_vm1 = vcmask 1043458   ;;  %vm27_vm3 = vcmask 406532   ;;  %s102_s11 = smov [#allocation5]  }
   0x6   :  { %vm26_vm2 = vmor %vm25_vm1, %vm24_vm0  ;;  %s35_s12 = sshll.u32 %s102_s11, 4  ;;  %s37_s15 = sshll.u32 %s120_s1, 4  ;;  %v23_v0 = vld [vmem:[#allocation2] sm:$0x3f]  ;;  %s36_s12 = int_to_ptr.vmem [resolvable:$true] %s35_s12  ;;  %s38_s15 = int_to_ptr.hbm [resolvable:$true] %s37_s15 }
   0x7   :  { %vm28_vm4 = vmor %vm27_vm3, %vm26_vm2 }
   0x8   :  { %29 = vst.msk [vmem:[#allocation5] sm:$0x3f] %vm28_vm4, %v23_v0 }
   0x9   :  { %40 = dma.vmem_to_hbm [thread:$0]  %s36_s12, 96, %s38_s15, [#allocation4]  }
   0xa   :  { %99 = dma.done.wait [#allocation4], 96  }
   0xb   :  { %100 = vsyncadd [#allocation4], 4294967200 }
   0xc   :  { %45 = vsyncpa [#allocation3], 1 }
   0xd   :  { %46 = vsyncpa [#allocation4], 1 }

</bundles_post_ra>
